<compile_context>
chip_gen: v7x
topology: tpu7x:2x2x1
jax: 0.10.0
libtpu: 0.0.40
codegen_flags: <defaults>
</compile_context>

<pallas_src>
import jax
import jax.numpy as jnp
from jax.experimental import pallas as pl
from jax.experimental.pallas import tpu as pltpu

_LANES = 128


def _cdiv(a, b):
    return -(-a // b)


def _cam_reg_kernel(s_ref, partial_ref):
    # s_ref:       (TILE_ROWS, 128) block of camera-scale values (lane-dense)
    # partial_ref: (1, 128) per-tile partial sums (lane-dense output)
    x = s_ref[...].astype(jnp.float32)
    val = jnp.exp(x * jnp.float32(-100.0))          # exp(-pred_cam[:, 0] * 10**2)
    partial_ref[...] = jnp.sum(val, axis=0, keepdims=True)


def cam_regularization_loss(pred_cam, *, tile_rows=512):
    """pred_cam: (B, C) float array (any float dtype). Returns scalar f32 loss."""
    B = pred_cam.shape[0]

    # Only column 0 enters the kernel.
    s = pred_cam[:, 0]                               # (B,)

    # Lane-dense layout: (rows, 128), rows a multiple of the tile size (>=8).
    rows_needed = _cdiv(B, _LANES)
    rows_rounded = _cdiv(rows_needed, 8) * 8
    tile_rows = max(8, min((tile_rows // 8) * 8, rows_rounded))
    num_tiles = _cdiv(rows_rounded, tile_rows)
    rows = num_tiles * tile_rows

    pad = rows * _LANES - B
    # Pad with +inf: exp(-100 * inf) == 0, so padding contributes nothing.
    s_pad = jnp.pad(s, (0, pad), constant_values=jnp.inf)
    s2d = s_pad.reshape(rows, _LANES)

    partials = pl.pallas_call(
        _cam_reg_kernel,
        out_shape=jax.ShapeDtypeStruct((num_tiles, _LANES), jnp.float32),
        grid=(num_tiles,),
        in_specs=[pl.BlockSpec((tile_rows, _LANES), lambda i: (i, 0))],
        out_specs=pl.BlockSpec((1, _LANES), lambda i: (i, 0)),
        compiler_params=pltpu.CompilerParams(
            dimension_semantics=("parallel",)),
    )(s2d)

    # Final tiny reduction + mean in plain JAX (fuses with surrounding ops).
    return jnp.sum(partials) / jnp.float32(B)


if __name__ == "__main__":
    key = jax.random.PRNGKey(0)

    # Small deterministic input: batch=8, 3 camera params (s, tx, ty).
    pred_cam = 0.1 * jax.random.normal(key, (8, 3), dtype=jnp.float32)
    loss = jax.block_until_ready(cam_regularization_loss(pred_cam))
    ref = jnp.mean(jnp.exp(-pred_cam[:, 0] * 100.0))
    assert jnp.allclose(loss, ref, rtol=1e-5, atol=1e-6), (loss, ref)

    # Larger batch to exercise the tiled/parallel multi-tile path.
    key2 = jax.random.PRNGKey(1)
    pred_cam_big = 0.05 * jax.random.normal(key2, (4096, 3), dtype=jnp.float32)
    loss_big = jax.block_until_ready(
        cam_regularization_loss(pred_cam_big, tile_rows=8))
    ref_big = jnp.mean(jnp.exp(-pred_cam_big[:, 0] * 100.0))
    assert jnp.allclose(loss_big, ref_big, rtol=1e-5, atol=1e-6), (loss_big, ref_big)

    print("KERNEL_OK")
</pallas_src>

<mosaic_0001>
module attributes {stable_mosaic.version = 11 : i64} {
  func.func @_cam_reg_kernel(%arg0: i32, %arg1: memref<8x128xf32, #tpu.memory_space<vmem>>, %arg2: memref<1x128xf32, #tpu.memory_space<vmem>>) attributes {dimension_semantics = [#tpu.dimension_semantics<parallel>], iteration_bounds = array<i64: 1>, scalar_prefetch = 0 : i64, scratch_operands = 0 : i64, tpu.core_type = #tpu.core_type<tc>, window_params = [{transform_indices = @transform_0, window_bounds = array<i64: 8, 128>}, {transform_indices = @transform_1, window_bounds = array<i64: 1, 128>}]} {
    %c0 = arith.constant 0 : index
    %c0_0 = arith.constant 0 : index
    %0 = vector.load %arg1[%c0, %c0_0] : memref<8x128xf32, #tpu.memory_space<vmem>>, vector<8x128xf32>
    %cst = arith.constant -1.000000e+02 : f32
    %1 = vector.broadcast %cst : f32 to vector<8x128xf32>
    %2 = arith.mulf %0, %1 : vector<8x128xf32>
    %3 = math.exp %2 : vector<8x128xf32>
    %cst_1 = arith.constant dense<0.000000e+00> : vector<128xf32>
    %4 = vector.multi_reduction <add>, %3, %cst_1 [0] : vector<8x128xf32> to vector<128xf32>
    %5 = vector.shape_cast %4 : vector<128xf32> to vector<1x128xf32>
    %c0_2 = arith.constant 0 : index
    %c0_3 = arith.constant 0 : index
    %6 = vector.load %arg2[%c0_2, %c0_3] : memref<1x128xf32, #tpu.memory_space<vmem>>, vector<1x128xf32>
    tpu.vector_store %arg2[%c0_2, %c0_3], %5 {strides = array<i32>} : memref<1x128xf32, #tpu.memory_space<vmem>>, vector<1x128xf32>,
    return
  }
  func.func @transform_0(%arg0: i32) -> (i32, i32) {
    %c0_i32 = arith.constant 0 : i32
    %c0_i32_0 = arith.constant 0 : i32
    return %arg0, %c0_i32 : i32, i32
  }
  func.func @transform_1(%arg0: i32) -> (i32, i32) {
    %c0_i32 = arith.constant 0 : i32
    %c0_i32_0 = arith.constant 0 : i32
    return %arg0, %c0_i32 : i32, i32
  }
}

</mosaic_0001>

<bundles_post_ra>
// kernel: tpu_custom_call.1
= control target key start
LH: loop header
LB: loop body
LE: loop exit
PB: predicated region body
PF: predicated region fallthrough
CT: control target
= control target key end

     0   :  { %6 = vsyncpa [#allocation3], 0  ;;  %s135_s0 = inlined_call_operand.hbm [shape: f32[8,128], index: 0, kind: input, shape index: {}]   ;;  %s136_s1 = inlined_call_operand.hbm [shape: f32[1,128], index: 1, kind: output, shape index: {}]  }
   0x1   :  { %7 = vsyncpa [#allocation4], 0  ;;  %s99_s6 = smov [#allocation2]   ;;  %s51_s10 = scalar_lea.hbm %s135_s0, 128 }
   0x2   :  { %s14_s7 = sshll.u32 %s99_s6, 4  ;;  %p52_p0 = scmp.ne.s32.totalorder %s135_s0, %s51_s10  ;;  %s15_s7 = int_to_ptr.vmem [resolvable:$true] %s14_s7 }
   0x3   :  { %p55_p1 = scmp.lt.u32.totalorder %s51_s10, %s135_s0 }
   0x5   :  { %p57_p2 = pnand %p55_p1, %p52_p0 }
   0x7   :  { %60 = shalt.err (!%p57_p2)
}
   0x8   :  { %s61_s15 = scalar_lea.vmem %s15_s7, 128  ;;  %p66_p4 = scmp.lt.s32.totalorder %s15_s7, %s15_s7 }
   0x9   :  { %p62_p3 = scmp.ne.s32.totalorder %s15_s7, %s61_s15  ;;  %p67_p5 = scmp.lt.s32.totalorder %s61_s15, %s61_s15 }
   0xb   :  { %p68_p6 = por %p67_p5, %p66_p4 }
   0xd   :  { %p69_p7 = pnand %p68_p6, %p62_p3 }
   0xf   :  { %72 = shalt.err (!%p69_p7)
}
  0x10   :  { %17 = dma.hbm_to_vmem [thread:$0]  %s135_s0, 128, %s15_s7, [#allocation3]  }
  0x11   :  { %95 = dma.done.wait [#allocation3], 128  }
  0x12   :  { %96 = vsyncadd [#allocation3], 4294967168  ;;  %v21_v0 = vld [vmem:[#allocation2] sm:$0xff]  ;;  %s100_s18 = smov [#allocation5]  }
  0x13   :  { %v22_v1 = vmul.f32 -100.0, %v21_v0  ;;  %s38_s19 = sshll.u32 %s100_s18, 4  ;;  %s39_s19 = int_to_ptr.vmem [resolvable:$true] %s38_s19 }
  0x14   :  { %s73_s20 = scalar_lea.vmem %s39_s19, 16  ;;  %s77_s0 = scalar_lea.vmem %s39_s19, 32 }
  0x15   :  { %v23_v2 = vmul.f32 1.442695, %v22_v1  ;;  %p74_p8 = scmp.ne.s32.totalorder %s39_s19, %s73_s20  ;;  %p78_p9 = scmp.lt.s32.totalorder %s39_s19, %s39_s19 }
  0x16   :  { %p79_p10 = scmp.lt.s32.totalorder %s77_s0, %s73_s20 }
  0x17   :  { %49 = vpow2.f32 %v23_v2 }
  0x18   :  { %p80_p11 = por %p79_p10, %p78_p9 }
  0x1a   :  { %p81_p12 = pnand %p80_p11, %p74_p8 }
  0x21   :  { %v50_v3 = vpop.eup %49 }
  0x22   :  { %v25_v4 = vrot.slane %v50_v3, 4 }
  0x24   :  { %v26_v5 = vadd.f32 %v50_v3, %v25_v4 }
  0x26   :  { %v27_v6 = vrot.slane %v26_v5, 2 }
  0x28   :  { %v28_v7 = vadd.f32 %v27_v6, %v26_v5 }
  0x2a   :  { %v29_v8 = vrot.slane %v28_v7, 1 }
  0x2c   :  { %v30_v9 = vadd.f32 %v29_v8, %v28_v7 }
  0x2e   :  { %31 = vst [vmem:[#allocation5] sm:$0x1] %v30_v9 }
  0x2f   :  { %84 = shalt.err (!%p81_p12)
}
  0x30   :  { %s85_s23 = scalar_lea.hbm %s136_s1, 16 }
  0x31   :  { %p86_p13 = scmp.ne.s32.totalorder %s136_s1, %s85_s23  ;;  %p89_p0 = scmp.lt.u32.totalorder %s85_s23, %s136_s1 }
  0x33   :  { %p91_p1 = pnand %p89_p0, %p86_p13 }
  0x35   :  { %94 = shalt.err (!%p91_p1)
}
  0x36   :  { %41 = dma.vmem_to_hbm [thread:$0]  %s39_s19, 16, %s136_s1, [#allocation4]  }
  0x37   :  { %97 = dma.done.wait [#allocation4], 16  }
  0x38   :  { %98 = vsyncadd [#allocation4], 4294967280 }
  0x39   :  { %45 = vsyncpa [#allocation3], 1 }
  0x3a   :  { %46 = vsyncpa [#allocation4], 1 }

</bundles_post_ra>
